<compile_context>
chip_gen: v7x
topology: tpu7x:2x2x1
jax: 0.10.0
libtpu: 0.0.40
codegen_flags: <defaults>
</compile_context>

<pallas_src>
import jax
import jax.numpy as jnp
from jax.experimental import pallas as pl
from jax.experimental.pallas import tpu as pltpu

LANE = 128


def _fc3_kernel(x_ref, w1_ref, b1_ref, w2_ref, b2_ref, w3_ref, b3_ref, o_ref):
    """Fused 3-layer MLP: relu(relu(x@W1+b1)@W2+b2)@W3+b3.

    x / W* are bf16 (MXU-native); accumulation + bias/ReLU epilogues in f32.
    All feature dims are padded to multiples of 128 (lane-dense tiles).
    """
    x = x_ref[...]                                                   # (TB, D_in) bf16
    h1 = jnp.dot(x, w1_ref[...], preferred_element_type=jnp.float32)
    h1 = jnp.maximum(h1 + b1_ref[...], 0.0)                          # f32 epilogue
    h2 = jnp.dot(h1.astype(w2_ref.dtype), w2_ref[...],
                 preferred_element_type=jnp.float32)
    h2 = jnp.maximum(h2 + b2_ref[...], 0.0)                          # f32 epilogue
    out = jnp.dot(h2.astype(w3_ref.dtype), w3_ref[...],
                  preferred_element_type=jnp.float32)
    o_ref[...] = (out + b3_ref[...]).astype(o_ref.dtype)


def _round_up(n, m):
    return ((n + m - 1) // m) * m


def _pad2(a, shape):
    """Zero-pad a 2-D array up to `shape` (trailing pad only)."""
    return jnp.pad(a, [(0, t - s) for s, t in zip(a.shape, shape)])


def fully_connected_forward(x_nchw, params, *, batch_tile=None,
                            compute_dtype=jnp.bfloat16):
    """Run the fused MLP on NCHW input x_nchw of shape (B, C, H, W)."""
    w1, b1, w2, b2, w3, b3 = params
    B = x_nchw.shape[0]
    d_in, h1 = w1.shape
    n_cls = w3.shape[1]

    tb = batch_tile if batch_tile is not None else B
    assert B % tb == 0, "batch must be divisible by batch_tile"
    assert tb % 8 == 0, "batch tile must be a multiple of 8 (sublane tile)"
    assert d_in % LANE == 0, "flattened input dim must be a multiple of 128"

    # Pad lane dims to 128 so every tile is lane-dense; zeros are inert
    # through bias-add + ReLU and the extra output columns are sliced off.
    h1_p = _round_up(h1, LANE)
    nc_p = _round_up(n_cls, LANE)

    # PyTorch x.view(B, -1) on NCHW: plain row-major flatten.
    x2d = x_nchw.reshape(B, -1).astype(compute_dtype)
    assert x2d.shape[1] == d_in

    w1p = _pad2(w1, (d_in, h1_p)).astype(compute_dtype)
    b1p = _pad2(b1, (1, h1_p)).astype(jnp.float32)
    w2p = _pad2(w2, (h1_p, nc_p)).astype(compute_dtype)
    b2p = _pad2(b2, (1, nc_p)).astype(jnp.float32)
    w3p = _pad2(w3, (nc_p, nc_p)).astype(compute_dtype)
    b3p = _pad2(b3, (1, nc_p)).astype(jnp.float32)

    full = lambda shape: pl.BlockSpec(shape, lambda i: (0, 0))

    out_padded = pl.pallas_call(
        _fc3_kernel,
        out_shape=jax.ShapeDtypeStruct((B, nc_p), jnp.float32),
        grid_spec=pltpu.PrefetchScalarGridSpec(
            num_scalar_prefetch=0,
            grid=(B // tb,),
            in_specs=[
                pl.BlockSpec((tb, d_in), lambda i: (i, 0)),  # x tile (bf16)
                full(w1p.shape),                             # W1 (D_in, H1p)
                full(b1p.shape),                             # b1 (1, H1p)
                full(w2p.shape),                             # W2 (H1p, NCp)
                full(b2p.shape),                             # b2 (1, NCp)
                full(w3p.shape),                             # W3 (NCp, NCp)
                full(b3p.shape),                             # b3 (1, NCp)
            ],
            out_specs=pl.BlockSpec((tb, nc_p), lambda i: (i, 0)),
        ),
        compiler_params=pltpu.CompilerParams(
            dimension_semantics=("parallel",)),
    )(x2d, w1p, b1p, w2p, b2p, w3p, b3p)

    return out_padded[:, :n_cls]


def init_params(key, d_in, h1, n_cls, dtype=jnp.float32):
    """Deterministic init mimicking nn.Linear (uniform +/- 1/sqrt(fan_in))."""
    ks = jax.random.split(key, 6)

    def lin(kw, kb, fan_in, fan_out):
        bound = 1.0 / jnp.sqrt(fan_in)
        w = jax.random.uniform(kw, (fan_in, fan_out), dtype, -bound, bound)
        b = jax.random.uniform(kb, (1, fan_out), dtype, -bound, bound)
        return w, b

    w1, b1 = lin(ks[0], ks[1], d_in, h1)
    w2, b2 = lin(ks[2], ks[3], h1, n_cls)
    w3, b3 = lin(ks[4], ks[5], n_cls, n_cls)
    return (w1, b1, w2, b2, w3, b3)


def reference_forward(x_nchw, params, compute_dtype=None):
    """Pure-JAX reference of the PyTorch forward (optionally bf16 operands)."""
    w1, b1, w2, b2, w3, b3 = params
    cast = (lambda a: a.astype(compute_dtype).astype(jnp.float32)) \
        if compute_dtype is not None else (lambda a: a)
    x = cast(x_nchw.reshape(x_nchw.shape[0], -1))
    x = jnp.maximum(x @ cast(w1) + b1, 0.0)
    x = jnp.maximum(cast(x) @ cast(w2) + b2, 0.0)
    return cast(x) @ cast(w3) + b3


if __name__ == "__main__":
    # Scaled-down but structurally faithful shapes:
    #   H=W=32, C=3 -> in_features = 3*32*32 = 3072 (analog of 224*224*3)
    #                  hidden      = 32*32//64 = 16 (analog of 224*224/64)
    #   num_classes = 16 (analog of 200), batch = 8
    B, C, H, W = 8, 3, 32, 32
    D_IN = C * H * W
    H1 = (H * W) // 64
    NUM_CLASSES = 16

    key = jax.random.PRNGKey(0)
    kx, kp = jax.random.split(key)
    x = jax.random.normal(kx, (B, C, H, W), jnp.float32)
    params = init_params(kp, D_IN, H1, NUM_CLASSES)

    out = fully_connected_forward(x, params)
    out = jax.block_until_ready(out)
    assert out.shape == (B, NUM_CLASSES)

    # Reference using the same bf16 operand casting (tight tolerance) ...
    ref_bf16 = reference_forward(x, params, compute_dtype=jnp.bfloat16)
    assert jnp.allclose(out, ref_bf16, atol=1e-2, rtol=1e-2), \
        "mismatch vs bf16-operand reference"
    # ... and the full-f32 reference (loose tolerance for bf16 rounding).
    ref_f32 = reference_forward(x, params)
    assert jnp.allclose(out, ref_f32, atol=1e-1, rtol=1e-1), \
        "mismatch vs f32 reference"

    print("KERNEL_OK")
</pallas_src>

<mosaic_0001>
module attributes {stable_mosaic.version = 11 : i64} {
  func.func @_fc3_kernel(%arg0: i32, %arg1: memref<8x3072xbf16, #tpu.memory_space<vmem>>, %arg2: memref<3072x128xbf16, #tpu.memory_space<vmem>>, %arg3: memref<1x128xf32, #tpu.memory_space<vmem>>, %arg4: memref<128x128xbf16, #tpu.memory_space<vmem>>, %arg5: memref<1x128xf32, #tpu.memory_space<vmem>>, %arg6: memref<128x128xbf16, #tpu.memory_space<vmem>>, %arg7: memref<1x128xf32, #tpu.memory_space<vmem>>, %arg8: memref<8x128xf32, #tpu.memory_space<vmem>>) attributes {dimension_semantics = [#tpu.dimension_semantics<parallel>], iteration_bounds = array<i64: 1>, scalar_prefetch = 0 : i64, scratch_operands = 0 : i64, tpu.core_type = #tpu.core_type<tc>, window_params = [{transform_indices = @transform_0, window_bounds = array<i64: 8, 3072>}, {pipeline_mode = #tpu.pipeline_mode<synchronous>, transform_indices = @transform_1, window_bounds = array<i64: 3072, 128>}, {pipeline_mode = #tpu.pipeline_mode<synchronous>, transform_indices = @transform_2, window_bounds = array<i64: 1, 128>}, {pipeline_mode = #tpu.pipeline_mode<synchronous>, transform_indices = @transform_3, window_bounds = array<i64: 128, 128>}, {pipeline_mode = #tpu.pipeline_mode<synchronous>, transform_indices = @transform_4, window_bounds = array<i64: 1, 128>}, {pipeline_mode = #tpu.pipeline_mode<synchronous>, transform_indices = @transform_5, window_bounds = array<i64: 128, 128>}, {pipeline_mode = #tpu.pipeline_mode<synchronous>, transform_indices = @transform_6, window_bounds = array<i64: 1, 128>}, {transform_indices = @transform_7, window_bounds = array<i64: 8, 128>}]} {
    %c0 = arith.constant 0 : index
    %c0_0 = arith.constant 0 : index
    %0 = vector.load %arg1[%c0, %c0_0] : memref<8x3072xbf16, #tpu.memory_space<vmem>>, vector<8x3072xbf16>
    %c0_1 = arith.constant 0 : index
    %c0_2 = arith.constant 0 : index
    %1 = vector.load %arg2[%c0_1, %c0_2] : memref<3072x128xbf16, #tpu.memory_space<vmem>>, vector<3072x128xbf16>
    %cst = arith.constant dense<0.000000e+00> : vector<8x128xf32>
    %2 = tpu.matmul %0, %1, %cst {dimension_numbers = #tpu.dot_dimension_numbers<[1], [0], [0], [1], [0, 0, 1, 1], [], []>} : vector<8x3072xbf16>, vector<3072x128xbf16>, vector<8x128xf32> -> vector<8x128xf32>
    %c0_3 = arith.constant 0 : index
    %c0_4 = arith.constant 0 : index
    %3 = vector.load %arg3[%c0_3, %c0_4] : memref<1x128xf32, #tpu.memory_space<vmem>>, vector<1x128xf32>
    %4 = vector.broadcast %3 : vector<1x128xf32> to vector<8x128xf32>
    %5 = arith.addf %2, %4 : vector<8x128xf32>
    %cst_5 = arith.constant 0.000000e+00 : f32
    %6 = vector.broadcast %cst_5 : f32 to vector<8x128xf32>
    %7 = arith.maximumf %5, %6 : vector<8x128xf32>
    %8 = arith.truncf %7 : vector<8x128xf32> to vector<8x128xbf16>
    %c0_6 = arith.constant 0 : index
    %c0_7 = arith.constant 0 : index
    %9 = vector.load %arg4[%c0_6, %c0_7] : memref<128x128xbf16, #tpu.memory_space<vmem>>, vector<128x128xbf16>
    %cst_8 = arith.constant dense<0.000000e+00> : vector<8x128xf32>
    %10 = tpu.matmul %8, %9, %cst_8 {dimension_numbers = #tpu.dot_dimension_numbers<[1], [0], [0], [1], [0, 0, 1, 1], [], []>} : vector<8x128xbf16>, vector<128x128xbf16>, vector<8x128xf32> -> vector<8x128xf32>
    %c0_9 = arith.constant 0 : index
    %c0_10 = arith.constant 0 : index
    %11 = vector.load %arg5[%c0_9, %c0_10] : memref<1x128xf32, #tpu.memory_space<vmem>>, vector<1x128xf32>
    %12 = vector.broadcast %11 : vector<1x128xf32> to vector<8x128xf32>
    %13 = arith.addf %10, %12 : vector<8x128xf32>
    %cst_11 = arith.constant 0.000000e+00 : f32
    %14 = vector.broadcast %cst_11 : f32 to vector<8x128xf32>
    %15 = arith.maximumf %13, %14 : vector<8x128xf32>
    %16 = arith.truncf %15 : vector<8x128xf32> to vector<8x128xbf16>
    %c0_12 = arith.constant 0 : index
    %c0_13 = arith.constant 0 : index
    %17 = vector.load %arg6[%c0_12, %c0_13] : memref<128x128xbf16, #tpu.memory_space<vmem>>, vector<128x128xbf16>
    %cst_14 = arith.constant dense<0.000000e+00> : vector<8x128xf32>
    %18 = tpu.matmul %16, %17, %cst_14 {dimension_numbers = #tpu.dot_dimension_numbers<[1], [0], [0], [1], [0, 0, 1, 1], [], []>} : vector<8x128xbf16>, vector<128x128xbf16>, vector<8x128xf32> -> vector<8x128xf32>
    %c0_15 = arith.constant 0 : index
    %c0_16 = arith.constant 0 : index
    %19 = vector.load %arg7[%c0_15, %c0_16] : memref<1x128xf32, #tpu.memory_space<vmem>>, vector<1x128xf32>
    %20 = vector.broadcast %19 : vector<1x128xf32> to vector<8x128xf32>
    %21 = arith.addf %18, %20 : vector<8x128xf32>
    %c0_17 = arith.constant 0 : index
    %c0_18 = arith.constant 0 : index
    %22 = vector.load %arg8[%c0_17, %c0_18] : memref<8x128xf32, #tpu.memory_space<vmem>>, vector<8x128xf32>
    tpu.vector_store %arg8[%c0_17, %c0_18], %21 {strides = array<i32>} : memref<8x128xf32, #tpu.memory_space<vmem>>, vector<8x128xf32>,
    return
  }
  func.func @transform_0(%arg0: i32) -> (i32, i32) {
    %c0_i32 = arith.constant 0 : i32
    %c0_i32_0 = arith.constant 0 : i32
    return %arg0, %c0_i32 : i32, i32
  }
  func.func @transform_1(%arg0: i32) -> (i32, i32) {
    %c0_i32 = arith.constant 0 : i32
    %c0_i32_0 = arith.constant 0 : i32
    %c0_i32_1 = arith.constant 0 : i32
    return %c0_i32, %c0_i32_0 : i32, i32
  }
  func.func @transform_2(%arg0: i32) -> (i32, i32) {
    %c0_i32 = arith.constant 0 : i32
    %c0_i32_0 = arith.constant 0 : i32
    %c0_i32_1 = arith.constant 0 : i32
    return %c0_i32, %c0_i32_0 : i32, i32
  }
  func.func @transform_3(%arg0: i32) -> (i32, i32) {
    %c0_i32 = arith.constant 0 : i32
    %c0_i32_0 = arith.constant 0 : i32
    %c0_i32_1 = arith.constant 0 : i32
    return %c0_i32, %c0_i32_0 : i32, i32
  }
  func.func @transform_4(%arg0: i32) -> (i32, i32) {
    %c0_i32 = arith.constant 0 : i32
    %c0_i32_0 = arith.constant 0 : i32
    %c0_i32_1 = arith.constant 0 : i32
    return %c0_i32, %c0_i32_0 : i32, i32
  }
  func.func @transform_5(%arg0: i32) -> (i32, i32) {
    %c0_i32 = arith.constant 0 : i32
    %c0_i32_0 = arith.constant 0 : i32
    %c0_i32_1 = arith.constant 0 : i32
    return %c0_i32, %c0_i32_0 : i32, i32
  }
  func.func @transform_6(%arg0: i32) -> (i32, i32) {
    %c0_i32 = arith.constant 0 : i32
    %c0_i32_0 = arith.constant 0 : i32
    %c0_i32_1 = arith.constant 0 : i32
    return %c0_i32, %c0_i32_0 : i32, i32
  }
  func.func @transform_7(%arg0: i32) -> (i32, i32) {
    %c0_i32 = arith.constant 0 : i32
    %c0_i32_0 = arith.constant 0 : i32
    return %arg0, %c0_i32 : i32, i32
  }
}

</mosaic_0001>

<bundles_post_ra>
// kernel: tpu_custom_call.1
= control target key start
LH: loop header
LB: loop body
LE: loop exit
PB: predicated region body
PF: predicated region fallthrough
CT: control target
= control target key end

     0   :  { %12 = vsyncpa [#allocation3], 0  ;;  %s3505_s0 = inlined_call_operand.hbm [shape: bf16[8,3072], index: 0, kind: input, shape index: {}]   ;;  %s3506_s1 = inlined_call_operand.hbm [shape: bf16[3072,128], index: 1, kind: input, shape index: {}]   ;;  %s3507_s2 = inlined_call_operand.vmem [shape: f32[1,128], index: 2, kind: input, shape index: {}]   ;;  %s3508_s3 = inlined_call_operand.hbm [shape: bf16[128,128], index: 3, kind: input, shape index: {}]   ;;  %s3509_s4 = inlined_call_operand.vmem [shape: f32[1,128], index: 4, kind: input, shape index: {}]   ;;  %s3510_s5 = inlined_call_operand.hbm [shape: bf16[128,128], index: 5, kind: input, shape index: {}]   ;;  %s3511_s6 = inlined_call_operand.vmem [shape: f32[1,128], index: 6, kind: input, shape index: {}]   ;;  %s3512_s7 = inlined_call_operand.hbm [shape: f32[8,128], index: 7, kind: output, shape index: {}]  }
   0x1   :  { %13 = vsyncpa [#allocation6], 0 }
   0x2   :  { %14 = vsyncpa [#allocation9], 0 }
   0x3   :  { %15 = vsyncpa [#allocation4], 0  ;;  %s3360_s24 = smov [#allocation5]   ;;  %s3242_s28 = scalar_lea.hbm %s3506_s1, 24576 }
   0x4   :  { %s31_s25 = sshll.u32 %s3360_s24, 4  ;;  %p3243_p0 = scmp.ne.s32.totalorder %s3506_s1, %s3242_s28  ;;  %s32_s25 = int_to_ptr.vmem [resolvable:$true] %s31_s25 }
   0x5   :  { %p3246_p1 = scmp.lt.u32.totalorder %s3242_s28, %s3506_s1 }
   0x7   :  { %p3248_p2 = pnand %p3246_p1, %p3243_p0 }
   0x9   :  { %3251 = shalt.err (!%p3248_p2)
}
   0xa   :  { %s3252_s10 = scalar_lea.vmem %s32_s25, 24576  ;;  %p3257_p4 = scmp.lt.s32.totalorder %s32_s25, %s32_s25 }
   0xb   :  { %p3253_p3 = scmp.ne.s32.totalorder %s32_s25, %s3252_s10  ;;  %p3258_p5 = scmp.lt.s32.totalorder %s3252_s10, %s3252_s10 }
   0xd   :  { %p3259_p6 = por %p3258_p5, %p3257_p4 }
   0xf   :  { %p3260_p7 = pnand %p3259_p6, %p3253_p3 }
  0x11   :  { %3263 = shalt.err (!%p3260_p7)
}
  0x12   :  { %s3361_s11 = smov 64   ;;  %s3362_s12 = smov 4  }
  0x13   :  { %37 = dma.hbm_to_vmem [thread:$0]  %s3506_s1, 24576, %s32_s25, [#allocation6], %s3361_s11, %s3361_s11, %s3362_s12  }
  0x14   :  { %s3363_s15 = smov [#allocation2]   ;;  %s3364_s17 = smov [#allocation7]  }
  0x15   :  { %s22_s16 = sshll.u32 %s3363_s15, 4  ;;  %s45_s18 = sshll.u32 %s3364_s17, 4  ;;  %s23_s16 = int_to_ptr.vmem [resolvable:$true] %s22_s16  ;;  %s46_s18 = int_to_ptr.vmem [resolvable:$true] %s45_s18 }
  0x16   :  { %s3264_s21 = scalar_lea.hbm %s3505_s0, 1536 }
  0x17   :  { %p3265_p8 = scmp.ne.s32.totalorder %s3505_s0, %s3264_s21  ;;  %p3268_p9 = scmp.lt.u32.totalorder %s3264_s21, %s3505_s0 }
  0x19   :  { %p3270_p10 = pnand %p3268_p9, %p3265_p8 }
  0x1b   :  { %3273 = shalt.err (!%p3270_p10)
}
  0x1c   :  { %s3274_s1 = scalar_lea.vmem %s23_s16, 1536  ;;  %p3279_p12 = scmp.lt.s32.totalorder %s23_s16, %s23_s16 }
  0x1d   :  { %p3275_p11 = scmp.ne.s32.totalorder %s23_s16, %s3274_s1  ;;  %p3280_p13 = scmp.lt.s32.totalorder %s3274_s1, %s3274_s1 }
  0x1f   :  { %p3281_p0 = por %p3280_p13, %p3279_p12 }
  0x21   :  { %p3282_p1 = pnand %p3281_p0, %p3275_p11 }
  0x23   :  { %3285 = shalt.err (!%p3282_p1)
}
  0x24   :  { %25 = dma.hbm_to_vmem [thread:$0]  %s3505_s0, 1536, %s23_s16, [#allocation3]  }
  0x25   :  { %s3286_s30 = scalar_lea.hbm %s3508_s3, 1024 }
  0x26   :  { %p3287_p2 = scmp.ne.s32.totalorder %s3508_s3, %s3286_s30  ;;  %p3290_p3 = scmp.lt.u32.totalorder %s3286_s30, %s3508_s3 }
  0x28   :  { %p3292_p4 = pnand %p3290_p3, %p3287_p2 }
  0x2a   :  { %3295 = shalt.err (!%p3292_p4)
}
  0x2b   :  { %s3296_s14 = scalar_lea.vmem %s46_s18, 1024  ;;  %p3301_p6 = scmp.lt.s32.totalorder %s46_s18, %s46_s18 }
  0x2c   :  { %p3297_p5 = scmp.ne.s32.totalorder %s46_s18, %s3296_s14  ;;  %p3302_p7 = scmp.lt.s32.totalorder %s3296_s14, %s3296_s14 }
  0x2e   :  { %p3303_p8 = por %p3302_p7, %p3301_p6 }
  0x30   :  { %p3304_p9 = pnand %p3303_p8, %p3297_p5 }
  0x32   :  { %3307 = shalt.err (!%p3304_p9)
}
  0x33   :  { %51 = dma.hbm_to_vmem [thread:$0]  %s3508_s3, 1024, %s46_s18, [#allocation6], %s3361_s11, %s3361_s11, %s3362_s12  }
  0x34   :  { %s3365_s16 = smov [#allocation8]   ;;  %s3308_s21 = scalar_lea.hbm %s3510_s5, 1024 }
  0x35   :  { %s59_s17 = sshll.u32 %s3365_s16, 4  ;;  %p3309_p10 = scmp.ne.s32.totalorder %s3510_s5, %s3308_s21  ;;  %s60_s17 = int_to_ptr.vmem [resolvable:$true] %s59_s17 }
  0x36   :  { %p3312_p11 = scmp.lt.u32.totalorder %s3308_s21, %s3510_s5 }
  0x38   :  { %p3314_p12 = pnand %p3312_p11, %p3309_p10 }
  0x3a   :  { %3317 = shalt.err (!%p3314_p12)
}
  0x3b   :  { %s3318_s1 = scalar_lea.vmem %s60_s17, 1024  ;;  %p3323_p0 = scmp.lt.s32.totalorder %s60_s17, %s60_s17 }
  0x3c   :  { %p3319_p13 = scmp.ne.s32.totalorder %s60_s17, %s3318_s1  ;;  %p3324_p1 = scmp.lt.s32.totalorder %s3318_s1, %s3318_s1 }
  0x3e   :  { %p3325_p2 = por %p3324_p1, %p3323_p0 }
  0x40   :  { %p3326_p3 = pnand %p3325_p2, %p3319_p13 }
  0x42   :  { %3329 = shalt.err (!%p3326_p3)
}
  0x43   :  { %65 = dma.hbm_to_vmem [thread:$0]  %s3510_s5, 1024, %s60_s17, [#allocation9], %s3361_s11, %s3361_s11, %s3362_s12  }
  0x44   :  { %3352 = dma.done.wait [#allocation3], 1536  }
  0x45   :  { %3353 = vsyncadd [#allocation3], 4294965760 }
  0x46   :  { %3354 = dma.done.wait [#allocation6], 25600  }
  0x47   :  { %3355 = vsyncadd [#allocation6], 4294941696 }
  0x48   :  { %3356 = dma.done.wait [#allocation9], 1024  }
  0x49   :  { %3357 = vsyncadd [#allocation9], 4294966272  ;;  %v3010_v0 = vld [vmem:[#allocation5 + $0x40] sm:$0xff]   ;;  %v3014_v4 = vld [vmem:[#allocation5 + $0x48] sm:$0xff]   ;;  %vm3367_vm0 = vmmov 0   ;;  %s3368_s28 = smov [#allocation10]  }
  0x4a   :  { %v3011_v1 = vld [vmem:[#allocation5 + $0xc0] sm:$0xff]   ;;  %2679 = vmatprep.subr.bf16.mxu0 %v3010_v0  ;;  %v3015_v5 = vld [vmem:[#allocation5 + $0xc8] sm:$0xff]   ;;  %v3018_v8 = vld [vmem:[#allocation5 + $0x50] sm:$0xff]   ;;  %s2433_s29 = sshll.u32 %s3368_s28, 4  ;;  %s2434_s29 = int_to_ptr.vmem [resolvable:$true] %s2433_s29 }
  0x4b   :  { %v3012_v2 = vld [vmem:[#allocation5] sm:$0xff]   ;;  %2701 = vmatprep.subr.bf16.mxu1 %v3011_v1  ;;  %v3016_v6 = vld [vmem:[#allocation5 + $0x8] sm:$0xff]   ;;  %v3019_v9 = vld [vmem:[#allocation5 + $0xd0] sm:$0xff]   ;;  %p3335_p5 = scmp.lt.s32.totalorder %s2434_s29, %s2434_s29 }
  0x4c   :  { %v3013_v3 = vld [vmem:[#allocation5 + $0x80] sm:$0xff]   ;;  %2680 = vmatpush3.bf16.msra.mxu0 %v3012_v2  ;;  %v3017_v7 = vld [vmem:[#allocation5 + $0x88] sm:$0xff]   ;;  %v3020_v10 = vld [vmem:[#allocation5 + $0x10] sm:$0xff]  }
  0x4d   :  { %2702 = vmatpush3.bf16.msra.mxu1 %v3013_v3  ;;  %2681 = vmatprep.subr.bf16.mxu0 %v3014_v4  ;;  %v3021_v11 = vld [vmem:[#allocation5 + $0x90] sm:$0xff]   ;;  %v3022_v12 = vld [vmem:[#allocation5 + $0x58] sm:$0xff]   ;;  %v3026_v16 = vld [vmem:[#allocation5 + $0x60] sm:$0xff]  }
  0x4e   :  { %2703 = vmatprep.subr.bf16.mxu1 %v3015_v5  ;;  %v3023_v13 = vld [vmem:[#allocation5 + $0xd8] sm:$0xff]   ;;  %v3027_v17 = vld [vmem:[#allocation5 + $0xe0] sm:$0xff]   ;;  %v3030_v20 = vld [vmem:[#allocation5 + $0x68] sm:$0xff]  }
  0x4f   :  { %v3024_v14 = vld [vmem:[#allocation5 + $0x18] sm:$0xff]   ;;  %v3028_v18 = vld [vmem:[#allocation5 + $0x20] sm:$0xff]   ;;  %v3031_v21 = vld [vmem:[#allocation5 + $0xe8] sm:$0xff]  }
  0x50   :  { %2682 = vmatpush3.bf16.msra.mxu0 %v3016_v6  ;;  %v3025_v15 = vld [vmem:[#allocation5 + $0x98] sm:$0xff]   ;;  %v3029_v19 = vld [vmem:[#allocation5 + $0xa0] sm:$0xff]   ;;  %v3032_v22 = vld [vmem:[#allocation5 + $0x28] sm:$0xff]  }
  0x51   :  { %2704 = vmatpush3.bf16.msra.mxu1 %v3017_v7  ;;  %2683 = vmatprep.subr.bf16.mxu0 %v3018_v8  ;;  %v3033_v23 = vld [vmem:[#allocation5 + $0xa8] sm:$0xff]   ;;  %v3034_v24 = vld [vmem:[#allocation5 + $0x70] sm:$0xff]   ;;  %v3038_v28 = vld [vmem:[#allocation5 + $0x78] sm:$0xff]  }
  0x52   :  { %2705 = vmatprep.subr.bf16.mxu1 %v3019_v9  ;;  %v3035_v25 = vld [vmem:[#allocation5 + $0xf0] sm:$0xff]   ;;  %v3039_v29 = vld [vmem:[#allocation5 + $0xf8] sm:$0xff]   ;;  %v81_v32 = vld [vmem:[#allocation2] sm:$0xff] }
  0x53   :  { %v3036_v26 = vld [vmem:[#allocation5 + $0x30] sm:$0xff]   ;;  %v3040_v30 = vld [vmem:[#allocation5 + $0x38] sm:$0xff]   ;;  %v82_v33 = vld [vmem:[#allocation2 + $0x8] sm:$0xff]  ;;  %v2445_v34 = vcombine.low %v81_v32, %v81_v32  ;;  %v2446_v35 = vcombine.high %v81_v32, %v81_v32 }
  0x54   :  { %2684 = vmatpush3.bf16.msra.mxu0 %v3020_v10  ;;  %v3037_v27 = vld [vmem:[#allocation5 + $0xb0] sm:$0xff]   ;;  %v3041_v31 = vld [vmem:[#allocation5 + $0xb8] sm:$0xff]   ;;  %v2447_v36 = vcombine.low %v82_v33, %v82_v33  ;;  %v2448_v37 = vcombine.high %v82_v33, %v82_v33  ;;  %v3046_v38 = vld [vmem:[#allocation5 + $0x140] sm:$0xff]  }
  0x55   :  { %2706 = vmatpush3.bf16.msra.mxu1 %v3021_v11  ;;  %2685 = vmatprep.subr.bf16.mxu0 %v3022_v12  ;;  %v3047_v39 = vld [vmem:[#allocation5 + $0x1c0] sm:$0xff]   ;;  %v3050_v42 = vld [vmem:[#allocation5 + $0x148] sm:$0xff]   ;;  %v3054_v46 = vld [vmem:[#allocation5 + $0x150] sm:$0xff]  }
  0x56   :  { %2707 = vmatprep.subr.bf16.mxu1 %v3023_v13  ;;  %1752 = vmatprep.mubr.bf16.mxu0 %v2446_v35  ;;  %v3048_v40 = vld [vmem:[#allocation5 + $0x100] sm:$0xff]   ;;  %v3051_v43 = vld [vmem:[#allocation5 + $0x1c8] sm:$0xff]   ;;  %v3055_v47 = vld [vmem:[#allocation5 + $0x1d0] sm:$0xff]  }
  0x57   :  { %1792 = vmatprep.mubr.bf16.mxu1 %v2448_v37  ;;  %v3049_v41 = vld [vmem:[#allocation5 + $0x180] sm:$0xff]   ;;  %v3052_v44 = vld [vmem:[#allocation5 + $0x108] sm:$0xff]   ;;  %v3056_v48 = vld [vmem:[#allocation5 + $0x110] sm:$0xff]  }
  0x58   :  { %2686 = vmatpush3.bf16.msra.mxu0 %v3024_v14  ;;  %v3053_v45 = vld [vmem:[#allocation5 + $0x188] sm:$0xff]   ;;  %v3057_v49 = vld [vmem:[#allocation5 + $0x190] sm:$0xff]   ;;  %v3058_v50 = vld [vmem:[#allocation5 + $0x158] sm:$0xff]  }
  0x59   :  { %2708 = vmatpush3.bf16.msra.mxu1 %v3025_v15  ;;  %2687 = vmatprep.subr.bf16.mxu0 %v3026_v16  ;;  %v3059_v51 = vld [vmem:[#allocation5 + $0x1d8] sm:$0xff]   ;;  %v3062_v54 = vld [vmem:[#allocation5 + $0x160] sm:$0xff]   ;;  %v3066_v58 = vld [vmem:[#allocation5 + $0x168] sm:$0xff]  }
  0x5a   :  { %2709 = vmatprep.subr.bf16.mxu1 %v3027_v17  ;;  %v3060_v52 = vld [vmem:[#allocation5 + $0x118] sm:$0xff]   ;;  %v3063_v55 = vld [vmem:[#allocation5 + $0x1e0] sm:$0xff]   ;;  %v3067_v59 = vld [vmem:[#allocation5 + $0x1e8] sm:$0xff]  }
  0x5b   :  { %v3061_v53 = vld [vmem:[#allocation5 + $0x198] sm:$0xff]   ;;  %v3064_v56 = vld [vmem:[#allocation5 + $0x120] sm:$0xff]   ;;  %v3068_v60 = vld [vmem:[#allocation5 + $0x128] sm:$0xff]  }
  0x5c   :  { %2688 = vmatpush3.bf16.msra.mxu0 %v3028_v18  ;;  %v3065_v57 = vld [vmem:[#allocation5 + $0x1a0] sm:$0xff]   ;;  %v3069_v61 = vld [vmem:[#allocation5 + $0x1a8] sm:$0xff]   ;;  %v3070_v62 = vld [vmem:[#allocation5 + $0x170] sm:$0xff]  }
  0x5d   :  { %2710 = vmatpush3.bf16.msra.mxu1 %v3029_v19  ;;  %2689 = vmatprep.subr.bf16.mxu0 %v3030_v20  ;;  %v3071_v63 = vld [vmem:[#allocation5 + $0x1f0] sm:$0xff]   ;;  %v3074_v2 = vld [vmem:[#allocation5 + $0x178] sm:$0xff]   ;;  %v3082_v12 = vld [vmem:[#allocation5 + $0x240] sm:$0xff]  }
  0x5e   :  { %2711 = vmatprep.subr.bf16.mxu1 %v3031_v21  ;;  %v3072_v0 = vld [vmem:[#allocation5 + $0x130] sm:$0xff]   ;;  %v3075_v3 = vld [vmem:[#allocation5 + $0x1f8] sm:$0xff]   ;;  %v3083_v13 = vld [vmem:[#allocation5 + $0x2c0] sm:$0xff]  }
  0x5f   :  { %v3073_v1 = vld [vmem:[#allocation5 + $0x1b0] sm:$0xff]   ;;  %v3076_v4 = vld [vmem:[#allocation5 + $0x138] sm:$0xff]   ;;  %v3084_v14 = vld [vmem:[#allocation5 + $0x200] sm:$0xff]  }
  0x60   :  { %2690 = vmatpush3.bf16.msra.mxu0 %v3032_v22  ;;  %v3077_v5 = vld [vmem:[#allocation5 + $0x1b8] sm:$0xff]   ;;  %v83_v6 = vld [vmem:[#allocation2 + $0x10] sm:$0xff]  ;;  %v3085_v15 = vld [vmem:[#allocation5 + $0x280] sm:$0xff]  }
  0x61   :  { %2712 = vmatpush3.bf16.msra.mxu1 %v3033_v23  ;;  %2691 = vmatprep.subr.bf16.mxu0 %v3034_v24  ;;  %v2449_v7 = vcombine.low %v83_v6, %v83_v6  ;;  %v2450_v8 = vcombine.high %v83_v6, %v83_v6  ;;  %v84_v9 = vld [vmem:[#allocation2 + $0x18] sm:$0xff]  ;;  %v3086_v16 = vld [vmem:[#allocation5 + $0x248] sm:$0xff]   ;;  %v3090_v20 = vld [vmem:[#allocation5 + $0x250] sm:$0xff]  }
  0x62   :  { %2713 = vmatprep.subr.bf16.mxu1 %v3035_v25  ;;  %v2451_v10 = vcombine.low %v84_v9, %v84_v9  ;;  %v2452_v11 = vcombine.high %v84_v9, %v84_v9  ;;  %v3087_v17 = vld [vmem:[#allocation5 + $0x2c8] sm:$0xff]   ;;  %v3091_v21 = vld [vmem:[#allocation5 + $0x2d0] sm:$0xff]   ;;  %v3094_v24 = vld [vmem:[#allocation5 + $0x258] sm:$0xff]  }
  0x63   :  { %v3088_v18 = vld [vmem:[#allocation5 + $0x208] sm:$0xff]   ;;  %v3092_v22 = vld [vmem:[#allocation5 + $0x210] sm:$0xff]   ;;  %v3095_v25 = vld [vmem:[#allocation5 + $0x2d8] sm:$0xff]  }
  0x64   :  { %2692 = vmatpush3.bf16.msra.mxu0 %v3036_v26  ;;  %v3089_v19 = vld [vmem:[#allocation5 + $0x288] sm:$0xff]   ;;  %v3093_v23 = vld [vmem:[#allocation5 + $0x290] sm:$0xff]   ;;  %v3096_v26 = vld [vmem:[#allocation5 + $0x218] sm:$0xff]  }
  0x65   :  { %2714 = vmatpush3.bf16.msra.mxu1 %v3037_v27  ;;  %2693 = vmatprep.subr.bf16.mxu0 %v3038_v28  ;;  %v3097_v27 = vld [vmem:[#allocation5 + $0x298] sm:$0xff]   ;;  %v3098_v28 = vld [vmem:[#allocation5 + $0x260] sm:$0xff]   ;;  %v3102_v32 = vld [vmem:[#allocation5 + $0x268] sm:$0xff]  }
  0x66   :  { %2715 = vmatprep.subr.bf16.mxu1 %v3039_v29  ;;  %v3099_v29 = vld [vmem:[#allocation5 + $0x2e0] sm:$0xff]   ;;  %v3103_v33 = vld [vmem:[#allocation5 + $0x2e8] sm:$0xff]   ;;  %v3107_v37 = vld [vmem:[#allocation5 + $0x2f0] sm:$0xff]  }
  0x67   :  { %v3105_v35 = vld [vmem:[#allocation5 + $0x2a8] sm:$0xff]  }
  0x68   :  { %2694 = vmatpush3.bf16.msra.mxu0 %v3040_v30  ;;  %v3100_v30 = vld [vmem:[#allocation5 + $0x220] sm:$0xff]   ;;  %v3138_v6 = vld [vmem:[#allocation5 + $0x368] sm:$0xff]  }
  0x69   :  { %2716 = vmatpush3.bf16.msra.mxu1 %v3041_v31  ;;  %2723 = vmatprep.subr.bf16.mxu0 %v3046_v38  ;;  %v3101_v31 = vld [vmem:[#allocation5 + $0x2a0] sm:$0xff]   ;;  %v3108_v38 = vld [vmem:[#allocation5 + $0x230] sm:$0xff]   ;;  %v3141_v9 = vld [vmem:[#allocation5 + $0x3a8] sm:$0xff]  }
  0x6a   :  { %2745 = vmatprep.subr.bf16.mxu1 %v3047_v39  ;;  %v3109_v39 = vld [vmem:[#allocation5 + $0x2b0] sm:$0xff]  }
  0x6b   :  { %1753 = vmatmul.mubr.bf16.vlgmr.msra.gmra.mrb[0].mxu0 %v2445_v34  ;;  %v3104_v34 = vld [vmem:[#allocation5 + $0x228] sm:$0xff]  }
  0x6c   :  { %1793 = vmatmul.mubr.bf16.vlgmr.msra.gmra.mrb[0].mxu1 %v2447_v36  ;;  %2724 = vmatpush3.bf16.msra.mxu0 %v3048_v40  ;;  %v3106_v36 = vld [vmem:[#allocation5 + $0x270] sm:$0xff]   ;;  %v3110_v40 = vld [vmem:[#allocation5 + $0x278] sm:$0xff]  }
  0x6d   :  { %2746 = vmatpush3.bf16.msra.mxu1 %v3049_v41  ;;  %2725 = vmatprep.subr.bf16.mxu0 %v3050_v42  ;;  %v3111_v41 = vld [vmem:[#allocation5 + $0x2f8] sm:$0xff]  }
  0x6e   :  { %2747 = vmatprep.subr.bf16.mxu1 %v3051_v43  ;;  %1832 = vmatprep.mubr.bf16.mxu0 %v2450_v8  ;;  %v3112_v42 = vld [vmem:[#allocation5 + $0x238] sm:$0xff]   ;;  %v3140_v8 = vld [vmem:[#allocation5 + $0x328] sm:$0xff]  }
  0x6f   :  { %1872 = vmatprep.mubr.bf16.mxu1 %v2452_v11  ;;  %v3113_v43 = vld [vmem:[#allocation5 + $0x2b8] sm:$0xff]   ;;  %v3143_v11 = vld [vmem:[#allocation5 + $0x3f0] sm:$0xff]  }
  0x70   :  { %2726 = vmatpush3.bf16.msra.mxu0 %v3052_v44  ;;  %v85_v44 = vld [vmem:[#allocation2 + $0x20] sm:$0xff] }
  0x71   :  { %2748 = vmatpush3.bf16.msra.mxu1 %v3053_v45  ;;  %2727 = vmatprep.subr.bf16.mxu0 %v3054_v46  ;;  %v86_v45 = vld [vmem:[#allocation2 + $0x28] sm:$0xff]  ;;  %v2453_v46 = vcombine.low %v85_v44, %v85_v44 }
  0x72   :  { %2749 = vmatprep.subr.bf16.mxu1 %v3055_v47  ;;  %v2454_v47 = vcombine.high %v85_v44, %v85_v44  ;;  %v3174_v44 = vld [vmem:[#allocation5 + $0x468] sm:$0xff]  }
  0x74   :  { %2728 = vmatpush3.bf16.msra.mxu0 %v3056_v48  ;;  %v2455_v48 = vcombine.low %v86_v45, %v86_v45 }
  0x75   :  { %2750 = vmatpush3.bf16.msra.mxu1 %v3057_v49  ;;  %2729 = vmatprep.subr.bf16.mxu0 %v3058_v50  ;;  %v2456_v49 = vcombine.high %v86_v45, %v86_v45  ;;  %v3118_v50 = vld [vmem:[#allocation5 + $0x340] sm:$0xff]   ;;  %v3175_v45 = vld [vmem:[#allocation5 + $0x4e8] sm:$0xff]  }
  0x76   :  { %2751 = vmatprep.subr.bf16.mxu1 %v3059_v51  ;;  %v3119_v51 = vld [vmem:[#allocation5 + $0x3c0] sm:$0xff]  }
  0x78   :  { %2730 = vmatpush3.bf16.msra.mxu0 %v3060_v52  ;;  %v3120_v52 = vld [vmem:[#allocation5 + $0x300] sm:$0xff]  }
  0x79   :  { %2752 = vmatpush3.bf16.msra.mxu1 %v3061_v53  ;;  %2731 = vmatprep.subr.bf16.mxu0 %v3062_v54  ;;  %v3121_v53 = vld [vmem:[#allocation5 + $0x380] sm:$0xff]   ;;  %v3122_v54 = vld [vmem:[#allocation5 + $0x348] sm:$0xff]  }
  0x7a   :  { %2753 = vmatprep.subr.bf16.mxu1 %v3063_v55  ;;  %v3123_v55 = vld [vmem:[#allocation5 + $0x3c8] sm:$0xff]  }
  0x7c   :  { %2732 = vmatpush3.bf16.msra.mxu0 %v3064_v56  ;;  %v3124_v56 = vld [vmem:[#allocation5 + $0x308] sm:$0xff]  }
  0x7d   :  { %2754 = vmatpush3.bf16.msra.mxu1 %v3065_v57  ;;  %2733 = vmatprep.subr.bf16.mxu0 %v3066_v58  ;;  %v3125_v57 = vld [vmem:[#allocation5 + $0x388] sm:$0xff]   ;;  %v3126_v58 = vld [vmem:[#allocation5 + $0x350] sm:$0xff]  }
  0x7e   :  { %2755 = vmatprep.subr.bf16.mxu1 %v3067_v59  ;;  %v3127_v59 = vld [vmem:[#allocation5 + $0x3d0] sm:$0xff]  }
  0x80   :  { %2734 = vmatpush3.bf16.msra.mxu0 %v3068_v60  ;;  %v3128_v60 = vld [vmem:[#allocation5 + $0x310] sm:$0xff]  }
  0x81   :  { %2756 = vmatpush3.bf16.msra.mxu1 %v3069_v61  ;;  %2735 = vmatprep.subr.bf16.mxu0 %v3070_v62  ;;  %v3129_v61 = vld [vmem:[#allocation5 + $0x390] sm:$0xff]   ;;  %v3130_v62 = vld [vmem:[#allocation5 + $0x358] sm:$0xff]  }
  0x82   :  { %2757 = vmatprep.subr.bf16.mxu1 %v3071_v63  ;;  %v3131_v63 = vld [vmem:[#allocation5 + $0x3d8] sm:$0xff]  }
  0x84   :  { %2736 = vmatpush3.bf16.msra.mxu0 %v3072_v0  ;;  %v3132_v0 = vld [vmem:[#allocation5 + $0x318] sm:$0xff]  }
  0x85   :  { %2758 = vmatpush3.bf16.msra.mxu1 %v3073_v1  ;;  %2737 = vmatprep.subr.bf16.mxu0 %v3074_v2  ;;  %v3133_v1 = vld [vmem:[#allocation5 + $0x398] sm:$0xff]   ;;  %v3134_v2 = vld [vmem:[#allocation5 + $0x360] sm:$0xff]  }
  0x86   :  { %2759 = vmatprep.subr.bf16.mxu1 %v3075_v3  ;;  %v3135_v3 = vld [vmem:[#allocation5 + $0x3e0] sm:$0xff]  }
  0x88   :  { %2738 = vmatpush3.bf16.msra.mxu0 %v3076_v4  ;;  %v3136_v4 = vld [vmem:[#allocation5 + $0x320] sm:$0xff]  }
  0x89   :  { %2760 = vmatpush3.bf16.msra.mxu1 %v3077_v5  ;;  %2767 = vmatprep.subr.bf16.mxu0 %v3082_v12  ;;  %v3137_v5 = vld [vmem:[#allocation5 + $0x3a0] sm:$0xff]   ;;  %v3144_v12 = vld [vmem:[#allocation5 + $0x330] sm:$0xff]  }
  0x8a   :  { %2789 = vmatprep.subr.bf16.mxu1 %v3083_v13  ;;  %v3145_v13 = vld [vmem:[#allocation5 + $0x3b0] sm:$0xff]  }
  0x8b   :  { %1833 = vmatmul.mubr.bf16.vlgmr.msra.gmra.mrb[4].mxu0 %v2449_v7  ;;  %v3139_v7 = vld [vmem:[#allocation5 + $0x3e8] sm:$0xff]  }
  0x8c   :  { %1873 = vmatmul.mubr.bf16.vlgmr.msra.gmra.mrb[4].mxu1 %v2451_v10  ;;  %2768 = vmatpush3.bf16.msra.mxu0 %v3084_v14  ;;  %v3142_v10 = vld [vmem:[#allocation5 + $0x370] sm:$0xff]   ;;  %v3146_v14 = vld [vmem:[#allocation5 + $0x378] sm:$0xff]  }
  0x8d   :  { %2790 = vmatpush3.bf16.msra.mxu1 %v3085_v15  ;;  %2769 = vmatprep.subr.bf16.mxu0 %v3086_v16  ;;  %v3147_v15 = vld [vmem:[#allocation5 + $0x3f8] sm:$0xff]  }
  0x8e   :  { %2791 = vmatprep.subr.bf16.mxu1 %v3087_v17  ;;  %1912 = vmatprep.mubr.bf16.mxu0 %v2454_v47  ;;  %v3148_v16 = vld [vmem:[#allocation5 + $0x338] sm:$0xff]   ;;  %v3177_v47 = vld [vmem:[#allocation5 + $0x4a8] sm:$0xff]  }
  0x8f   :  { %1952 = vmatprep.mubr.bf16.mxu1 %v2456_v49  ;;  %v3149_v17 = vld [vmem:[#allocation5 + $0x3b8] sm:$0xff]   ;;  %v3179_v49 = vld [vmem:[#allocation5 + $0x4f0] sm:$0xff]  }
  0x90   :  { %2770 = vmatpush3.bf16.msra.mxu0 %v3088_v18  ;;  %v87_v18 = vld [vmem:[#allocation2 + $0x30] sm:$0xff] }
  0x91   :  { %2792 = vmatpush3.bf16.msra.mxu1 %v3089_v19  ;;  %2771 = vmatprep.subr.bf16.mxu0 %v3090_v20  ;;  %v88_v19 = vld [vmem:[#allocation2 + $0x38] sm:$0xff]  ;;  %v2457_v20 = vcombine.low %v87_v18, %v87_v18 }
  0x92   :  { %2793 = vmatprep.subr.bf16.mxu1 %v3091_v21  ;;  %v2458_v21 = vcombine.high %v87_v18, %v87_v18  ;;  %v3210_v18 = vld [vmem:[#allocation5 + $0x568] sm:$0xff]  }
  0x94   :  { %2772 = vmatpush3.bf16.msra.mxu0 %v3092_v22  ;;  %v2459_v22 = vcombine.low %v88_v19, %v88_v19 }
  0x95   :  { %2794 = vmatpush3.bf16.msra.mxu1 %v3093_v23  ;;  %2773 = vmatprep.subr.bf16.mxu0 %v3094_v24  ;;  %v3154_v23 = vld [vmem:[#allocation5 + $0x440] sm:$0xff]   ;;  %v2460_v24 = vcombine.high %v88_v19, %v88_v19  ;;  %v3211_v19 = vld [vmem:[#allocation5 + $0x5e8] sm:$0xff]  }
  0x96   :  { %2795 = vmatprep.subr.bf16.mxu1 %v3095_v25  ;;  %v3155_v25 = vld [vmem:[#allocation5 + $0x4c0] sm:$0xff]  }
  0x98   :  { %2774 = vmatpush3.bf16.msra.mxu0 %v3096_v26  ;;  %v3156_v26 = vld [vmem:[#allocation5 + $0x400] sm:$0xff]  }
  0x99   :  { %2796 = vmatpush3.bf16.msra.mxu1 %v3097_v27  ;;  %2775 = vmatprep.subr.bf16.mxu0 %v3098_v28  ;;  %v3157_v27 = vld [vmem:[#allocation5 + $0x480] sm:$0xff]   ;;  %v3158_v28 = vld [vmem:[#allocation5 + $0x448] sm:$0xff]  }
  0x9a   :  { %2797 = vmatprep.subr.bf16.mxu1 %v3099_v29  ;;  %v3159_v29 = vld [vmem:[#allocation5 + $0x4c8] sm:$0xff]  }
  0x9c   :  { %2776 = vmatpush3.bf16.msra.mxu0 %v3100_v30  ;;  %v3160_v30 = vld [vmem:[#allocation5 + $0x408] sm:$0xff]  }
  0x9d   :  { %2798 = vmatpush3.bf16.msra.mxu1 %v3101_v31  ;;  %2777 = vmatprep.subr.bf16.mxu0 %v3102_v32  ;;  %v3161_v31 = vld [vmem:[#allocation5 + $0x488] sm:$0xff]   ;;  %v3162_v32 = vld [vmem:[#allocation5 + $0x450] sm:$0xff]  }
  0x9e   :  { %2799 = vmatprep.subr.bf16.mxu1 %v3103_v33  ;;  %v3163_v33 = vld [vmem:[#allocation5 + $0x4d0] sm:$0xff]  }
  0xa0   :  { %2778 = vmatpush3.bf16.msra.mxu0 %v3104_v34  ;;  %v3164_v34 = vld [vmem:[#allocation5 + $0x410] sm:$0xff]  }
  0xa1   :  { %2800 = vmatpush3.bf16.msra.mxu1 %v3105_v35  ;;  %2779 = vmatprep.subr.bf16.mxu0 %v3106_v36  ;;  %v3165_v35 = vld [vmem:[#allocation5 + $0x490] sm:$0xff]   ;;  %v3166_v36 = vld [vmem:[#allocation5 + $0x458] sm:$0xff]  }
  0xa2   :  { %2801 = vmatprep.subr.bf16.mxu1 %v3107_v37  ;;  %v3167_v37 = vld [vmem:[#allocation5 + $0x4d8] sm:$0xff]  }
  0xa4   :  { %2780 = vmatpush3.bf16.msra.mxu0 %v3108_v38  ;;  %v3168_v38 = vld [vmem:[#allocation5 + $0x418] sm:$0xff]  }
  0xa5   :  { %2802 = vmatpush3.bf16.msra.mxu1 %v3109_v39  ;;  %2781 = vmatprep.subr.bf16.mxu0 %v3110_v40  ;;  %v3169_v39 = vld [vmem:[#allocation5 + $0x498] sm:$0xff]   ;;  %v3170_v40 = vld [vmem:[#allocation5 + $0x460] sm:$0xff]  }
  0xa6   :  { %2803 = vmatprep.subr.bf16.mxu1 %v3111_v41  ;;  %v3171_v41 = vld [vmem:[#allocation5 + $0x4e0] sm:$0xff]  }
  0xa8   :  { %2782 = vmatpush3.bf16.msra.mxu0 %v3112_v42  ;;  %v3172_v42 = vld [vmem:[#allocation5 + $0x420] sm:$0xff]  }
  0xa9   :  { %2804 = vmatpush3.bf16.msra.mxu1 %v3113_v43  ;;  %2811 = vmatprep.subr.bf16.mxu0 %v3118_v50  ;;  %v3173_v43 = vld [vmem:[#allocation5 + $0x4a0] sm:$0xff]   ;;  %v3180_v50 = vld [vmem:[#allocation5 + $0x430] sm:$0xff]  }
  0xaa   :  { %2833 = vmatprep.subr.bf16.mxu1 %v3119_v51  ;;  %v3181_v51 = vld [vmem:[#allocation5 + $0x4b0] sm:$0xff]  }
  0xab   :  { %1913 = vmatmul.mubr.bf16.vlgmr.msra.gmra.mrb[8].mxu0 %v2453_v46  ;;  %v3176_v46 = vld [vmem:[#allocation5 + $0x428] sm:$0xff]  }
  0xac   :  { %1953 = vmatmul.mubr.bf16.vlgmr.msra.gmra.mrb[8].mxu1 %v2455_v48  ;;  %2812 = vmatpush3.bf16.msra.mxu0 %v3120_v52  ;;  %v3178_v48 = vld [vmem:[#allocation5 + $0x470] sm:$0xff]   ;;  %v3182_v52 = vld [vmem:[#allocation5 + $0x478] sm:$0xff]  }
  0xad   :  { %2834 = vmatpush3.bf16.msra.mxu1 %v3121_v53  ;;  %2813 = vmatprep.subr.bf16.mxu0 %v3122_v54  ;;  %v3183_v53 = vld [vmem:[#allocation5 + $0x4f8] sm:$0xff]  }
  0xae   :  { %2835 = vmatprep.subr.bf16.mxu1 %v3123_v55  ;;  %1992 = vmatprep.mubr.bf16.mxu0 %v2458_v21  ;;  %v3184_v54 = vld [vmem:[#allocation5 + $0x438] sm:$0xff]   ;;  %v3213_v21 = vld [vmem:[#allocation5 + $0x5a8] sm:$0xff]  }
  0xaf   :  { %2032 = vmatprep.mubr.bf16.mxu1 %v2460_v24  ;;  %v3185_v55 = vld [vmem:[#allocation5 + $0x4b8] sm:$0xff]   ;;  %v3216_v24 = vld [vmem:[#allocation5 + $0x530] sm:$0xff]  }
  0xb0   :  { %2814 = vmatpush3.bf16.msra.mxu0 %v3124_v56  ;;  %v89_v56 = vld [vmem:[#allocation2 + $0x40] sm:$0xff] }
  0xb1   :  { %2836 = vmatpush3.bf16.msra.mxu1 %v3125_v57  ;;  %2815 = vmatprep.subr.bf16.mxu0 %v3126_v58  ;;  %v2461_v57 = vcombine.low %v89_v56, %v89_v56  ;;  %v2462_v58 = vcombine.high %v89_v56, %v89_v56 }
  0xb2   :  { %2837 = vmatprep.subr.bf16.mxu1 %v3127_v59  ;;  %v90_v59 = vld [vmem:[#allocation2 + $0x48] sm:$0xff] }
  0xb4   :  { %2816 = vmatpush3.bf16.msra.mxu0 %v3128_v60  ;;  %v2463_v60 = vcombine.low %v90_v59, %v90_v59 }
  0xb5   :  { %2838 = vmatpush3.bf16.msra.mxu1 %v3129_v61  ;;  %2817 = vmatprep.subr.bf16.mxu0 %v3130_v62  ;;  %v2464_v61 = vcombine.high %v90_v59, %v90_v59  ;;  %v3190_v62 = vld [vmem:[#allocation5 + $0x540] sm:$0xff]  }
  0xb6   :  { %2839 = vmatprep.subr.bf16.mxu1 %v3131_v63  ;;  %v3191_v63 = vld [vmem:[#allocation5 + $0x5c0] sm:$0xff]  }
  0xb8   :  { %2818 = vmatpush3.bf16.msra.mxu0 %v3132_v0  ;;  %v3192_v0 = vld [vmem:[#allocation5 + $0x500] sm:$0xff]  }
  0xb9   :  { %2840 = vmatpush3.bf16.msra.mxu1 %v3133_v1  ;;  %2819 = vmatprep.subr.bf16.mxu0 %v3134_v2  ;;  %v3193_v1 = vld [vmem:[#allocation5 + $0x580] sm:$0xff]   ;;  %v3194_v2 = vld [vmem:[#allocation5 + $0x548] sm:$0xff]  }
  0xba   :  { %2841 = vmatprep.subr.bf16.mxu1 %v3135_v3  ;;  %v3195_v3 = vld [vmem:[#allocation5 + $0x5c8] sm:$0xff]  }
  0xbc   :  { %2820 = vmatpush3.bf16.msra.mxu0 %v3136_v4  ;;  %v3196_v4 = vld [vmem:[#allocation5 + $0x508] sm:$0xff]  }
  0xbd   :  { %2842 = vmatpush3.bf16.msra.mxu1 %v3137_v5  ;;  %2821 = vmatprep.subr.bf16.mxu0 %v3138_v6  ;;  %v3197_v5 = vld [vmem:[#allocation5 + $0x588] sm:$0xff]   ;;  %v3198_v6 = vld [vmem:[#allocation5 + $0x550] sm:$0xff]  }
  0xbe   :  { %2843 = vmatprep.subr.bf16.mxu1 %v3139_v7  ;;  %v3199_v7 = vld [vmem:[#allocation5 + $0x5d0] sm:$0xff]  }
  0xc0   :  { %2822 = vmatpush3.bf16.msra.mxu0 %v3140_v8  ;;  %v3200_v8 = vld [vmem:[#allocation5 + $0x510] sm:$0xff]  }
  0xc1   :  { %2844 = vmatpush3.bf16.msra.mxu1 %v3141_v9  ;;  %2823 = vmatprep.subr.bf16.mxu0 %v3142_v10  ;;  %v3201_v9 = vld [vmem:[#allocation5 + $0x590] sm:$0xff]   ;;  %v3202_v10 = vld [vmem:[#allocation5 + $0x558] sm:$0xff]  }
  0xc2   :  { %2845 = vmatprep.subr.bf16.mxu1 %v3143_v11  ;;  %v3203_v11 = vld [vmem:[#allocation5 + $0x5d8] sm:$0xff]  }
  0xc4   :  { %2824 = vmatpush3.bf16.msra.mxu0 %v3144_v12  ;;  %v3204_v12 = vld [vmem:[#allocation5 + $0x518] sm:$0xff]  }
  0xc5   :  { %2846 = vmatpush3.bf16.msra.mxu1 %v3145_v13  ;;  %2825 = vmatprep.subr.bf16.mxu0 %v3146_v14  ;;  %v3205_v13 = vld [vmem:[#allocation5 + $0x598] sm:$0xff]   ;;  %v3206_v14 = vld [vmem:[#allocation5 + $0x560] sm:$0xff]  }
  0xc6   :  { %2847 = vmatprep.subr.bf16.mxu1 %v3147_v15  ;;  %v3207_v15 = vld [vmem:[#allocation5 + $0x5e0] sm:$0xff]  }
  0xc8   :  { %2826 = vmatpush3.bf16.msra.mxu0 %v3148_v16  ;;  %v3208_v16 = vld [vmem:[#allocation5 + $0x520] sm:$0xff]  }
  0xc9   :  { %2848 = vmatpush3.bf16.msra.mxu1 %v3149_v17  ;;  %2855 = vmatprep.subr.bf16.mxu0 %v3154_v23  ;;  %v3209_v17 = vld [vmem:[#allocation5 + $0x5a0] sm:$0xff]   ;;  %v3215_v23 = vld [vmem:[#allocation5 + $0x5f0] sm:$0xff]  }
  0xca   :  { %2877 = vmatprep.subr.bf16.mxu1 %v3155_v25  ;;  %v3217_v25 = vld [vmem:[#allocation5 + $0x5b0] sm:$0xff]  }
  0xcb   :  { %1993 = vmatmul.mubr.bf16.vlgmr.msra.gmra.mrb[12].mxu0 %v2457_v20  ;;  %v3212_v20 = vld [vmem:[#allocation5 + $0x528] sm:$0xff]  }
  0xcc   :  { %2033 = vmatmul.mubr.bf16.vlgmr.msra.gmra.mrb[12].mxu1 %v2459_v22  ;;  %2856 = vmatpush3.bf16.msra.mxu0 %v3156_v26  ;;  %v3214_v22 = vld [vmem:[#allocation5 + $0x570] sm:$0xff]   ;;  %v3218_v26 = vld [vmem:[#allocation5 + $0x578] sm:$0xff]  }
  0xcd   :  { %2878 = vmatpush3.bf16.msra.mxu1 %v3157_v27  ;;  %2857 = vmatprep.subr.bf16.mxu0 %v3158_v28  ;;  %v3219_v27 = vld [vmem:[#allocation5 + $0x5f8] sm:$0xff]  }
  0xce   :  { %2879 = vmatprep.subr.bf16.mxu1 %v3159_v29  ;;  %2072 = vmatprep.mubr.bf16.mxu0 %v2462_v58  ;;  %v3220_v28 = vld [vmem:[#allocation5 + $0x538] sm:$0xff]  }
  0xcf   :  { %2112 = vmatprep.mubr.bf16.mxu1 %v2464_v61  ;;  %v3221_v29 = vld [vmem:[#allocation5 + $0x5b8] sm:$0xff]  }
  0xd0   :  { %2858 = vmatpush3.bf16.msra.mxu0 %v3160_v30  ;;  %v91_v30 = vld [vmem:[#allocation2 + $0x50] sm:$0xff] }
  0xd1   :  { %2880 = vmatpush3.bf16.msra.mxu1 %v3161_v31  ;;  %2859 = vmatprep.subr.bf16.mxu0 %v3162_v32  ;;  %v92_v31 = vld [vmem:[#allocation2 + $0x58] sm:$0xff]  ;;  %v2465_v32 = vcombine.low %v91_v30, %v91_v30 }
  0xd2   :  { %2881 = vmatprep.subr.bf16.mxu1 %v3163_v33  ;;  %v2466_v33 = vcombine.high %v91_v30, %v91_v30 }
  0xd4   :  { %2860 = vmatpush3.bf16.msra.mxu0 %v3164_v34  ;;  %v2467_v34 = vcombine.low %v92_v31, %v92_v31 }
  0xd5   :  { %2882 = vmatpush3.bf16.msra.mxu1 %v3165_v35  ;;  %2861 = vmatprep.subr.bf16.mxu0 %v3166_v36  ;;  %v2468_v35 = vcombine.high %v92_v31, %v92_v31 }
  0xd6   :  { %2883 = vmatprep.subr.bf16.mxu1 %v3167_v37 }
  0xd8   :  { %2862 = vmatpush3.bf16.msra.mxu0 %v3168_v38  ;;  %v2444_v38 = vld [vmem:[%s3507_s2] ss:$0 sm:$0xff] }
  0xd9   :  { %2884 = vmatpush3.bf16.msra.mxu1 %v3169_v39  ;;  %2863 = vmatprep.subr.bf16.mxu0 %v3170_v40 }
  0xda   :  { %2885 = vmatprep.subr.bf16.mxu1 %v3171_v41 }
  0xdc   :  { %2864 = vmatpush3.bf16.msra.mxu0 %v3172_v42 }
  0xdd   :  { %2886 = vmatpush3.bf16.msra.mxu1 %v3173_v43  ;;  %2865 = vmatprep.subr.bf16.mxu0 %v3174_v44 }
  0xde   :  { %2887 = vmatprep.subr.bf16.mxu1 %v3175_v45 }
  0xe0   :  { %2866 = vmatpush3.bf16.msra.mxu0 %v3176_v46 }
  0xe1   :  { %2888 = vmatpush3.bf16.msra.mxu1 %v3177_v47  ;;  %2867 = vmatprep.subr.bf16.mxu0 %v3178_v48 }
  0xe2   :  { %2889 = vmatprep.subr.bf16.mxu1 %v3179_v49  ;;  %v3226_v49 = vld [vmem:[#allocation7] sm:$0xff]  }
  0xe4   :  { %2868 = vmatpush3.bf16.msra.mxu0 %v3180_v50  ;;  %v3366_v50 = vmov 0.0  }
  0xe5   :  { %2890 = vmatpush3.bf16.msra.mxu1 %v3181_v51  ;;  %2869 = vmatprep.subr.bf16.mxu0 %v3182_v52  ;;  %v3227_v51 = vld [vmem:[#allocation7 + $0x8] sm:$0xff]   ;;  %v3228_v52 = vld [vmem:[#allocation7 + $0x10] sm:$0xff]  }
  0xe6   :  { %2891 = vmatprep.subr.bf16.mxu1 %v3183_v53  ;;  %v3229_v53 = vld [vmem:[#allocation7 + $0x18] sm:$0xff]  }
  0xe8   :  { %2870 = vmatpush3.bf16.msra.mxu0 %v3184_v54  ;;  %v3230_v54 = vld [vmem:[#allocation7 + $0x20] sm:$0xff]  }
  0xe9   :  { %2892 = vmatpush3.bf16.msra.mxu1 %v3185_v55  ;;  %2899 = vmatprep.subr.bf16.mxu0 %v3190_v62 }
  0xea   :  { %2921 = vmatprep.subr.bf16.mxu1 %v3191_v63  ;;  %v3231_v63 = vld [vmem:[#allocation7 + $0x28] sm:$0xff]  }
  0xeb   :  { %2073 = vmatmul.mubr.bf16.vlgmr.msra.gmra.mrb[16].mxu0 %v2461_v57 }
  0xec   :  { %2113 = vmatmul.mubr.bf16.vlgmr.msra.gmra.mrb[16].mxu1 %v2463_v60  ;;  %2900 = vmatpush3.bf16.msra.mxu0 %v3192_v0 }
  0xed   :  { %2922 = vmatpush3.bf16.msra.mxu1 %v3193_v1  ;;  %2901 = vmatprep.subr.bf16.mxu0 %v3194_v2 }
  0xee   :  { %2923 = vmatprep.subr.bf16.mxu1 %v3195_v3  ;;  %2152 = vmatprep.mubr.bf16.mxu0 %v2466_v33 }
  0xef   :  { %2192 = vmatprep.mubr.bf16.mxu1 %v2468_v35 }
  0xf0   :  { %2902 = vmatpush3.bf16.msra.mxu0 %v3196_v4  ;;  %v3232_v4 = vld [vmem:[#allocation7 + $0x30] sm:$0xff]  }
  0xf1   :  { %2924 = vmatpush3.bf16.msra.mxu1 %v3197_v5  ;;  %2903 = vmatprep.subr.bf16.mxu0 %v3198_v6  ;;  %v3233_v5 = vld [vmem:[#allocation7 + $0x38] sm:$0xff]   ;;  %v3234_v6 = vld [vmem:[#allocation8] sm:$0xff]  }
  0xf2   :  { %2925 = vmatprep.subr.bf16.mxu1 %v3199_v7  ;;  %v3235_v7 = vld [vmem:[#allocation8 + $0x8] sm:$0xff]  }
  0xf4   :  { %2904 = vmatpush3.bf16.msra.mxu0 %v3200_v8  ;;  %v3236_v8 = vld [vmem:[#allocation8 + $0x10] sm:$0xff]  }
  0xf5   :  { %2926 = vmatpush3.bf16.msra.mxu1 %v3201_v9  ;;  %2905 = vmatprep.subr.bf16.mxu0 %v3202_v10  ;;  %v3237_v9 = vld [vmem:[#allocation8 + $0x18] sm:$0xff]   ;;  %v3238_v10 = vld [vmem:[#allocation8 + $0x20] sm:$0xff]  }
  0xf6   :  { %2927 = vmatprep.subr.bf16.mxu1 %v3203_v11 }
  0xf8   :  { %2906 = vmatpush3.bf16.msra.mxu0 %v3204_v12  ;;  %v3239_v12 = vld [vmem:[#allocation8 + $0x28] sm:$0xff]  }
  0xf9   :  { %2928 = vmatpush3.bf16.msra.mxu1 %v3205_v13  ;;  %2907 = vmatprep.subr.bf16.mxu0 %v3206_v14 }
  0xfa   :  { %2929 = vmatprep.subr.bf16.mxu1 %v3207_v15 }
  0xfc   :  { %2908 = vmatpush3.bf16.msra.mxu0 %v3208_v16 }
  0xfd   :  { %2930 = vmatpush3.bf16.msra.mxu1 %v3209_v17  ;;  %2909 = vmatprep.subr.bf16.mxu0 %v3210_v18 }
  0xfe   :  { %2931 = vmatprep.subr.bf16.mxu1 %v3211_v19 }
 0x100   :  { %2910 = vmatpush3.bf16.msra.mxu0 %v3212_v20 }
 0x101   :  { %2932 = vmatpush3.bf16.msra.mxu1 %v3213_v21  ;;  %2911 = vmatprep.subr.bf16.mxu0 %v3214_v22 }
 0x102   :  { %2933 = vmatprep.subr.bf16.mxu1 %v3215_v23 }
 0x104   :  { %2912 = vmatpush3.bf16.msra.mxu0 %v3216_v24 }
 0x105   :  { %2934 = vmatpush3.bf16.msra.mxu1 %v3217_v25  ;;  %2913 = vmatprep.subr.bf16.mxu0 %v3218_v26 }
 0x106   :  { %2935 = vmatprep.subr.bf16.mxu1 %v3219_v27 }
 0x108   :  { %2914 = vmatpush3.bf16.msra.mxu0 %v3220_v28 }
 0x109   :  { %2936 = vmatpush3.bf16.msra.mxu1 %v3221_v29  ;;  %2961 = vmatprep.subr.bf16.mxu0 %v3366_v50 }
 0x10a   :  { %2981 = vmatprep.subr.bf16.mxu1 %v3366_v50 }
 0x10b   :  { %2153 = vmatmul.mubr.bf16.vlgmr.msra.gmra.mrb[20].mxu0 %v2465_v32 }
 0x10c   :  { %2193 = vmatmul.mubr.bf16.vlgmr.msra.gmra.mrb[20].mxu1 %v2467_v34  ;;  %2962 = vmatpush3.bf16.msra.mxu0 %v3226_v49 }
 0x10d   :  { %2963 = vmatprep.subr.bf16.mxu0 %v3366_v50  ;;  %2977 = vmatprep.mubr.msk.bf16.mxu0 %vm3367_vm0, %v3366_v50 }
 0x10e   :  { %2997 = vmatprep.mubr.msk.bf16.mxu1 %vm3367_vm0, %v3366_v50  ;;  %2982 = vmatpush3.bf16.msra.mxu1 %v3234_v6 }
 0x10f   :  { %2983 = vmatprep.subr.bf16.mxu1 %v3366_v50 }
 0x110   :  { %2964 = vmatpush3.bf16.msra.mxu0 %v3227_v51 }
 0x111   :  { %2965 = vmatprep.subr.bf16.mxu0 %v3366_v50 }
 0x112   :  { %2984 = vmatpush3.bf16.msra.mxu1 %v3235_v7 }
 0x113   :  { %2985 = vmatprep.subr.bf16.mxu1 %v3366_v50 }
 0x114   :  { %2966 = vmatpush3.bf16.msra.mxu0 %v3228_v52 }
 0x115   :  { %2967 = vmatprep.subr.bf16.mxu0 %v3366_v50 }
 0x116   :  { %2986 = vmatpush3.bf16.msra.mxu1 %v3236_v8 }
 0x117   :  { %2987 = vmatprep.subr.bf16.mxu1 %v3366_v50 }
 0x118   :  { %2968 = vmatpush3.bf16.msra.mxu0 %v3229_v53 }
 0x119   :  { %2969 = vmatprep.subr.bf16.mxu0 %v3366_v50 }
 0x11a   :  { %2988 = vmatpush3.bf16.msra.mxu1 %v3237_v9  ;;  %v2670_v9 = vld [vmem:[%s3511_s6] ss:$0 sm:$0xff] }
 0x11b   :  { %2989 = vmatprep.subr.bf16.mxu1 %v3366_v50 }
 0x11c   :  { %2970 = vmatpush3.bf16.msra.mxu0 %v3230_v54 }
 0x11d   :  { %2971 = vmatprep.subr.bf16.mxu0 %v3366_v50 }
 0x11e   :  { %2990 = vmatpush3.bf16.msra.mxu1 %v3238_v10 }
 0x11f   :  { %2991 = vmatprep.subr.bf16.mxu1 %v3366_v50 }
 0x120   :  { %2972 = vmatpush3.bf16.msra.mxu0 %v3231_v63  ;;  %v3240_v63 = vld [vmem:[#allocation8 + $0x30] sm:$0xff]  }
 0x121   :  { %2973 = vmatprep.subr.bf16.mxu0 %v3366_v50 }
 0x122   :  { %2992 = vmatpush3.bf16.msra.mxu1 %v3239_v12 }
 0x123   :  { %2993 = vmatprep.subr.bf16.mxu1 %v3366_v50 }
 0x124   :  { %2974 = vmatpush3.bf16.msra.mxu0 %v3232_v4 }
 0x125   :  { %2975 = vmatprep.subr.bf16.mxu0 %v3366_v50 }
 0x126   :  { %2994 = vmatpush3.bf16.msra.mxu1 %v3240_v63 }
 0x127   :  { %2995 = vmatprep.subr.bf16.mxu1 %v3366_v50 }
 0x128   :  { %2976 = vmatpush3.bf16.msra.mxu0 %v3233_v5 }
 0x13e   :  { %v2695_v36 = vpop.f32.mrb[0].mxu0 }
 0x13f   :  { %v2717_v37 = vpop.f32.mrb[0].mxu1  ;;  %v2696_v39 = vpop.f32.mrb[1].mxu0 }
 0x140   :  { %v2718_v40 = vpop.f32.mrb[1].mxu1  ;;  %v2697_v41 = vadd.f32 %v2696_v39, %v2695_v36  ;;  %v2698_v43 = vpop.f32.mrb[2].mxu0 }
 0x141   :  { %v2719_v42 = vadd.f32 %v2718_v40, %v2717_v37  ;;  %v2720_v44 = vpop.f32.mrb[2].mxu1  ;;  %v2699_v45 = vpop.f32.mrb[3].mxu0 }
 0x142   :  { %v2721_v46 = vpop.f32.mrb[3].mxu1  ;;  %v1755_v47 = vadd.f32 %v2697_v41, %v2444_v38 }
 0x144   :  { %v1795_v48 = vadd.f32 %v2719_v42, %v1755_v47 }
 0x15e   :  { %v2739_v55 = vpop.f32.mrb[4].mxu0 }
 0x15f   :  { %v2761_v56 = vpop.f32.mrb[4].mxu1  ;;  %v2740_v57 = vpop.f32.mrb[5].mxu0 }
 0x160   :  { %v2762_v58 = vpop.f32.mrb[5].mxu1  ;;  %v2741_v59 = vadd.f32 %v2740_v57, %v2739_v55  ;;  %v2742_v61 = vpop.f32.mrb[6].mxu0 }
 0x161   :  { %v2763_v60 = vadd.f32 %v2762_v58, %v2761_v56  ;;  %v2764_v62 = vpop.f32.mrb[6].mxu1  ;;  %v2743_v0 = vpop.f32.mrb[7].mxu0 }
 0x162   :  { %v2765_v1 = vpop.f32.mrb[7].mxu1  ;;  %v1835_v2 = vadd.f32 %v2741_v59, %v1795_v48  ;;  %v3241_v0 = vld [vmem:[#allocation8 + $0x38] sm:$0xff]  }
 0x163   :  { %2996 = vmatpush3.bf16.msra.mxu1 %v3241_v0  ;;  %v2661_v1 = vld [vmem:[%s3509_s4] ss:$0 sm:$0xff]  ;;  %s3330_s4 = scalar_lea.vmem %s2434_s29, 128 }
 0x164   :  { %v1875_v3 = vadd.f32 %v2763_v60, %v1835_v2  ;;  %p3331_p4 = scmp.ne.s32.totalorder %s2434_s29, %s3330_s4  ;;  %p3336_p6 = scmp.lt.s32.totalorder %s3330_s4, %s3330_s4 }
 0x166   :  { %p3337_p7 = por %p3336_p6, %p3335_p5 }
 0x168   :  { %p3338_p8 = pnand %p3337_p7, %p3331_p4 }
 0x17e   :  { %v2783_v11 = vpop.f32.mrb[8].mxu0 }
 0x17f   :  { %v2805_v13 = vpop.f32.mrb[8].mxu1  ;;  %v2784_v14 = vpop.f32.mrb[9].mxu0 }
 0x180   :  { %v2785_v15 = vadd.f32 %v2784_v14, %v2783_v11  ;;  %v2806_v16 = vpop.f32.mrb[9].mxu1  ;;  %v2786_v17 = vpop.f32.mrb[10].mxu0 }
 0x181   :  { %v2807_v18 = vadd.f32 %v2806_v16, %v2805_v13  ;;  %v2808_v19 = vpop.f32.mrb[10].mxu1  ;;  %v2787_v20 = vpop.f32.mrb[11].mxu0 }
 0x182   :  { %v1915_v21 = vadd.f32 %v2785_v15, %v1875_v3  ;;  %v2809_v22 = vpop.f32.mrb[11].mxu1 }
 0x184   :  { %v1955_v23 = vadd.f32 %v2807_v18, %v1915_v21 }
 0x19e   :  { %v2827_v24 = vpop.f32.mrb[12].mxu0 }
 0x19f   :  { %v2849_v25 = vpop.f32.mrb[12].mxu1  ;;  %v2828_v26 = vpop.f32.mrb[13].mxu0 }
 0x1a0   :  { %v2829_v27 = vadd.f32 %v2828_v26, %v2827_v24  ;;  %v2850_v28 = vpop.f32.mrb[13].mxu1  ;;  %v2830_v29 = vpop.f32.mrb[14].mxu0 }
 0x1a1   :  { %v2851_v30 = vadd.f32 %v2850_v28, %v2849_v25  ;;  %v2852_v31 = vpop.f32.mrb[14].mxu1  ;;  %v2831_v32 = vpop.f32.mrb[15].mxu0 }
 0x1a2   :  { %v1995_v33 = vadd.f32 %v2829_v27, %v1955_v23  ;;  %v2853_v34 = vpop.f32.mrb[15].mxu1 }
 0x1a4   :  { %v2035_v35 = vadd.f32 %v2851_v30, %v1995_v33 }
 0x1be   :  { %v2871_v36 = vpop.f32.mrb[16].mxu0 }
 0x1bf   :  { %v2893_v37 = vpop.f32.mrb[16].mxu1  ;;  %v2872_v38 = vpop.f32.mrb[17].mxu0 }
 0x1c0   :  { %v2894_v39 = vpop.f32.mrb[17].mxu1  ;;  %v2873_v40 = vadd.f32 %v2872_v38, %v2871_v36  ;;  %v2874_v42 = vpop.f32.mrb[18].mxu0 }
 0x1c1   :  { %v2895_v41 = vadd.f32 %v2894_v39, %v2893_v37  ;;  %v2896_v43 = vpop.f32.mrb[18].mxu1  ;;  %v2875_v44 = vpop.f32.mrb[19].mxu0 }
 0x1c2   :  { %v2897_v45 = vpop.f32.mrb[19].mxu1  ;;  %v2075_v46 = vadd.f32 %v2873_v40, %v2035_v35 }
 0x1c4   :  { %v2115_v47 = vadd.f32 %v2895_v41, %v2075_v46 }
 0x1de   :  { %v2915_v48 = vpop.f32.mrb[20].mxu0 }
 0x1df   :  { %v2937_v49 = vpop.f32.mrb[20].mxu1  ;;  %v2916_v51 = vpop.f32.mrb[21].mxu0 }
 0x1e0   :  { %v2917_v52 = vadd.f32 %v2916_v51, %v2915_v48  ;;  %v2938_v53 = vpop.f32.mrb[21].mxu1  ;;  %v2918_v54 = vpop.f32.mrb[22].mxu0 }
 0x1e1   :  { %v2939_v55 = vadd.f32 %v2938_v53, %v2937_v49  ;;  %v2940_v56 = vpop.f32.mrb[22].mxu1  ;;  %v2919_v57 = vpop.f32.mrb[23].mxu0 }
 0x1e2   :  { %v2155_v58 = vadd.f32 %v2917_v52, %v2115_v47  ;;  %v2941_v59 = vpop.f32.mrb[23].mxu1 }
 0x1e4   :  { %v2195_v60 = vadd.f32 %v2939_v55, %v2155_v58 }
 0x1e6   :  { %v2200_v61 = vmax.f32 %v2195_v60, 0.0 }
 0x1e8   :  { %v2201_v62 = vpack.c.bf16 %v2200_v61, %v2200_v61 }
 0x1ea   :  { %2978 = vmatmul.mubr.bf16.vlgmr.msra.gmra.mrb[24].mxu0 %v2201_v62 }
 0x2bd   :  { %v2307_v2 = vpop.f32.mrb[24].mxu0 }
 0x2be   :  { %v2308_v3 = vadd.f32 %v2661_v1, %v2307_v2  ;;  %v2979_v4 = vpop.f32.mrb[25].mxu0 }
 0x2bf   :  { %v2310_v5 = vpop.f32.mrb[26].mxu0 }
 0x2c0   :  { %v2313_v6 = vmax.f32 %v2308_v3, 0.0  ;;  %v2980_v7 = vpop.f32.mrb[27].mxu0 }
 0x2c2   :  { %v2314_v8 = vpack.c.bf16 %v2313_v6, %v2313_v6 }
 0x2c4   :  { %2998 = vmatmul.mubr.bf16.vlgmr.msra.gmra.mrb[24].mxu1 %v2314_v8 }
 0x397   :  { %v2420_v50 = vpop.f32.mrb[24].mxu1 }
 0x398   :  { %v2421_v10 = vadd.f32 %v2670_v9, %v2420_v50  ;;  %v2999_v11 = vpop.f32.mrb[25].mxu1 }
 0x399   :  { %v2423_v12 = vpop.f32.mrb[26].mxu1 }
 0x39a   :  { %2426 = vst [vmem:[#allocation10] sm:$0xff] %v2421_v10  ;;  %v3000_v13 = vpop.f32.mrb[27].mxu1 }
 0x39b   :  { %3341 = shalt.err (!%p3338_p8)
}
 0x39c   :  { %s3342_s6 = scalar_lea.hbm %s3512_s7, 128 }
 0x39d   :  { %p3343_p9 = scmp.ne.s32.totalorder %s3512_s7, %s3342_s6  ;;  %p3346_p10 = scmp.lt.u32.totalorder %s3342_s6, %s3512_s7 }
 0x39f   :  { %p3348_p11 = pnand %p3346_p10, %p3343_p9 }
 0x3a1   :  { %3351 = shalt.err (!%p3348_p11)
}
 0x3a2   :  { %2436 = dma.vmem_to_hbm [thread:$0]  %s2434_s29, 128, %s3512_s7, [#allocation4]  }
 0x3a3   :  { %3358 = dma.done.wait [#allocation4], 128  }
 0x3a4   :  { %3359 = vsyncadd [#allocation4], 4294967168 }
 0x3a5   :  { %2440 = vsyncpa [#allocation3], 1 }
 0x3a6   :  { %2441 = vsyncpa [#allocation6], 1 }
 0x3a7   :  { %2442 = vsyncpa [#allocation9], 1 }
 0x3a8   :  { %2443 = vsyncpa [#allocation4], 1 }

</bundles_post_ra>
